<compile_context>
chip_gen: v7x
topology: tpu7x:2x2x1
jax: 0.10.0
libtpu: 0.0.40
codegen_flags: <defaults>
</compile_context>

<pallas_src>
import functools

import jax
import jax.numpy as jnp
from jax.experimental import pallas as pl
from jax.experimental.pallas import tpu as pltpu


def _round_up(n, m):
    return ((n + m - 1) // m) * m


def vae_kernel(x_ref, w1_ref, b1_ref, wh_ref, bh_ref, w2_ref, b2_ref,
               w3_ref, b3_ref, eps_ref,
               recon_ref, mu_ref, logvar_ref, *, latent_dim, latent_p):
    # encode: h = relu(x @ W1 + b1)   (bf16 MXU inputs, f32 accumulate)
    x = x_ref[...].astype(jnp.bfloat16)
    h = jnp.dot(x, w1_ref[...], preferred_element_type=jnp.float32) + b1_ref[...]
    h = jnp.maximum(h, 0.0).astype(jnp.bfloat16)

    # fused mu|logvar head: one matmul; mu in lanes [0, latent_p), logvar in
    # [latent_p, 2*latent_p) -> the split lands on a 128-lane boundary.
    head = jnp.dot(h, wh_ref[...], preferred_element_type=jnp.float32) + bh_ref[...]
    mu = head[:, :latent_dim]
    logvar = head[:, latent_p:latent_p + latent_dim]

    # reparameterize: z = mu + eps * exp(0.5 * logvar)   (f32 EUP/VPU path)
    std = jnp.exp(0.5 * logvar)
    z = mu + eps_ref[...] * std

    # decode: recon = relu(z @ W2 + b2) @ W3 + b3
    h2 = jnp.dot(z.astype(jnp.bfloat16), w2_ref[...],
                 preferred_element_type=jnp.float32) + b2_ref[...]
    h2 = jnp.maximum(h2, 0.0).astype(jnp.bfloat16)
    recon = jnp.dot(h2, w3_ref[...], preferred_element_type=jnp.float32) + b3_ref[...]

    recon_ref[...] = recon.astype(recon_ref.dtype)
    mu_ref[...] = mu
    logvar_ref[...] = logvar


@functools.partial(jax.jit, static_argnames=("dims", "pdims", "tb"))
def _vae_forward_impl(x, eps, w1, b1, wh, bh, w2, b2, w3, b3, *, dims, pdims, tb):
    input_dim, hidden_dim, latent_dim = dims
    hidden_p, latent_p = pdims
    B = x.shape[0]

    # Batch tiling policy:
    #  * >= 2 grid steps when B >= 16 so both v7x TensorCores get work,
    #  * tile rows are a multiple of 8 (sublane granularity),
    #  * tile sized from B so row padding stays small.
    if B >= 16:
        n_tiles = max(2, -(-B // tb))
    else:
        n_tiles = 1
    tb_eff = _round_up(-(-B // n_tiles), 8)
    b_pad = n_tiles * tb_eff

    if b_pad != B:  # row-only pad, f32, only when needed
        x = jnp.pad(x, ((0, b_pad - B), (0, 0)))
        eps = jnp.pad(eps, ((0, b_pad - B), (0, 0)))

    grid = (n_tiles,)

    def batch_spec(d):
        return pl.BlockSpec((tb_eff, d), lambda i: (i, 0))

    def resident_spec(shape):
        # constant index_map -> weights/biases fetched once, VMEM-resident across steps
        return pl.BlockSpec(shape, lambda i: (0, 0))

    in_specs = [
        batch_spec(input_dim),
        resident_spec(w1.shape), resident_spec(b1.shape),
        resident_spec(wh.shape), resident_spec(bh.shape),
        resident_spec(w2.shape), resident_spec(b2.shape),
        resident_spec(w3.shape), resident_spec(b3.shape),
        batch_spec(latent_dim),
    ]
    out_shapes = (
        jax.ShapeDtypeStruct((b_pad, input_dim), jnp.bfloat16),   # recon (bf16 writeback)
        jax.ShapeDtypeStruct((b_pad, latent_dim), jnp.float32),   # mu
        jax.ShapeDtypeStruct((b_pad, latent_dim), jnp.float32),   # logvar
    )
    out_specs = (batch_spec(input_dim), batch_spec(latent_dim), batch_spec(latent_dim))

    # Advisory cost estimate so XLA schedules surrounding ops around the custom call.
    flops = 2 * b_pad * (input_dim * hidden_p + hidden_p * 2 * latent_p
                         + latent_dim * hidden_p + hidden_p * input_dim)
    weight_bytes = sum(int(a.size) * a.dtype.itemsize
                       for a in (w1, b1, wh, bh, w2, b2, w3, b3))
    bytes_accessed = (weight_bytes
                      + b_pad * input_dim * 4 + b_pad * latent_dim * 4       # x, eps in
                      + b_pad * input_dim * 2 + 2 * b_pad * latent_dim * 4)  # recon, mu, logvar out
    cost = pl.CostEstimate(flops=flops,
                           transcendentals=b_pad * latent_dim,
                           bytes_accessed=bytes_accessed)

    recon_p, mu_p, logvar_p = pl.pallas_call(
        functools.partial(vae_kernel, latent_dim=latent_dim, latent_p=latent_p),
        out_shape=out_shapes,
        grid=grid,
        in_specs=in_specs,
        out_specs=out_specs,
        compiler_params=pltpu.CompilerParams(
            dimension_semantics=("parallel",),   # batch tiles shard across TCs on v7x
            vmem_limit_bytes=48 << 20,           # fits v7x's 64 MiB physical VMEM
        ),
        cost_estimate=cost,
    )(x, w1, b1, wh, bh, w2, b2, w3, b3, eps)

    # Only the (often no-op) row slice back to B; no feature-dim re-slice.
    return recon_p[:B], mu_p[:B], logvar_p[:B]


def vae_forward(x, packed_params, eps, *, tb=512):
    """Runs the fused VAE forward pass. Returns (x_reconstructed[bf16], mu, logvar)."""
    w1, b1, wh, bh, w2, b2, w3, b3 = packed_params["weights"]
    return _vae_forward_impl(x, eps, w1, b1, wh, bh, w2, b2, w3, b3,
                             dims=packed_params["dims"],
                             pdims=packed_params["pdims"], tb=tb)


def init_vae_params(key, input_dim, hidden_dim, latent_dim):
    """Deterministic init mimicking nn.Linear shapes.

    Weights are stored as [in, out] (transposed vs. PyTorch's [out, in]),
    biases as [out]. All f32 (logical / un-padded).
    """
    keys = jax.random.split(key, 10)

    def linear(kw, kb, fan_in, fan_out):
        bound = 1.0 / jnp.sqrt(jnp.float32(fan_in))
        w = jax.random.uniform(kw, (fan_in, fan_out), jnp.float32, -bound, bound)
        b = jax.random.uniform(kb, (fan_out,), jnp.float32, -bound, bound)
        return w, b

    w1, b1 = linear(keys[0], keys[1], input_dim, hidden_dim)     # fc1
    wmu, bmu = linear(keys[2], keys[3], hidden_dim, latent_dim)  # fc_mu
    wlv, blv = linear(keys[4], keys[5], hidden_dim, latent_dim)  # fc_logvar
    w2, b2 = linear(keys[6], keys[7], latent_dim, hidden_dim)    # fc2
    w3, b3 = linear(keys[8], keys[9], hidden_dim, input_dim)     # fc3
    return (w1, b1, wmu, bmu, wlv, blv, w2, b2, w3, b3)


def pack_vae_params(params, input_dim, hidden_dim, latent_dim):
    """Fuse the mu|logvar head and cast matmul weights to bf16.

    Only *internal* feature dims (hidden, head latent lanes) are zero-padded to 128-lane
    multiples; activation-facing dims (x's input_dim, eps's latent_dim, output widths)
    stay logical so the wrapper never pads/casts/slices activations over features.
    Invariant: padded hidden columns of W1/b1 and padded head columns are zero, so all
    padded lanes of intermediate activations are exactly zero.
    """
    w1, b1, wmu, bmu, wlv, blv, w2, b2, w3, b3 = params
    hidden_p = _round_up(hidden_dim, 128)
    latent_p = _round_up(latent_dim, 128)
    dh = hidden_p - hidden_dim

    w1_p = jnp.pad(w1, ((0, 0), (0, dh))).astype(jnp.bfloat16)          # (input_dim, hidden_p)
    b1_p = jnp.pad(b1.reshape(1, -1), ((0, 0), (0, dh)))                # (1, hidden_p)

    # fused head: columns [0, latent_p) = mu, [latent_p, 2*latent_p) = logvar
    wh = jnp.zeros((hidden_p, 2 * latent_p), jnp.float32)
    wh = wh.at[:hidden_dim, :latent_dim].set(wmu)
    wh = wh.at[:hidden_dim, latent_p:latent_p + latent_dim].set(wlv)
    wh = wh.astype(jnp.bfloat16)
    bh = jnp.zeros((1, 2 * latent_p), jnp.float32)
    bh = bh.at[0, :latent_dim].set(bmu)
    bh = bh.at[0, latent_p:latent_p + latent_dim].set(blv)

    w2_p = jnp.pad(w2, ((0, 0), (0, dh))).astype(jnp.bfloat16)          # (latent_dim, hidden_p)
    b2_p = jnp.pad(b2.reshape(1, -1), ((0, 0), (0, dh)))                # (1, hidden_p)
    w3_p = jnp.pad(w3, ((0, dh), (0, 0))).astype(jnp.bfloat16)          # (hidden_p, input_dim)
    b3_p = b3.reshape(1, -1)                                            # (1, input_dim)

    return {
        "weights": (w1_p, b1_p, wh, bh, w2_p, b2_p, w3_p, b3_p),
        "dims": (input_dim, hidden_dim, latent_dim),
        "pdims": (hidden_p, latent_p),
    }


def vae_forward_ref(x, params, eps):
    """Pure-JAX reference mirroring the kernel's bf16-matmul / f32-accumulate math."""
    w1, b1, wmu, bmu, wlv, blv, w2, b2, w3, b3 = params
    bf = lambda a: a.astype(jnp.bfloat16)
    dot = lambda a, b: jnp.dot(bf(a), bf(b), preferred_element_type=jnp.float32)
    h = jnp.maximum(dot(x, w1) + b1, 0.0)
    mu = dot(h, wmu) + bmu
    logvar = dot(h, wlv) + blv
    z = mu + eps * jnp.exp(0.5 * logvar)
    h2 = jnp.maximum(dot(z, w2) + b2, 0.0)
    recon = dot(h2, w3) + b3
    return recon, mu, logvar


if __name__ == "__main__":
    # Small shapes consistent with the module: x is [batch, input_dim].
    batch, input_dim, hidden_dim, latent_dim = 64, 64, 32, 16

    key = jax.random.PRNGKey(0)
    k_params, k_x, k_eps = jax.random.split(key, 3)

    params = init_vae_params(k_params, input_dim, hidden_dim, latent_dim)
    x = jax.random.normal(k_x, (batch, input_dim), jnp.float32)
    eps = jax.random.normal(k_eps, (batch, latent_dim), jnp.float32)

    packed = pack_vae_params(params, input_dim, hidden_dim, latent_dim)
    recon, mu, logvar = vae_forward(x, packed, eps)
    jax.block_until_ready((recon, mu, logvar))

    # Verify against the pure-JAX reference (bf16 matmuls + bf16 recon store -> loosened tol).
    recon_r, mu_r, logvar_r = vae_forward_ref(x, params, eps)
    assert recon.shape == (batch, input_dim) and recon.dtype == jnp.bfloat16
    assert mu.shape == (batch, latent_dim) and logvar.shape == (batch, latent_dim)
    assert jnp.allclose(recon.astype(jnp.float32), recon_r, atol=2e-2, rtol=2e-2)
    assert jnp.allclose(mu, mu_r, atol=1e-2, rtol=1e-2)
    assert jnp.allclose(logvar, logvar_r, atol=1e-2, rtol=1e-2)

    print("KERNEL_OK")
</pallas_src>

<mosaic_0001>
module attributes {stable_mosaic.version = 11 : i64} {
  func.func @vae_kernel(%arg0: i32, %arg1: memref<32x64xf32, #tpu.memory_space<vmem>>, %arg2: memref<64x128xbf16, #tpu.memory_space<vmem>>, %arg3: memref<1x128xf32, #tpu.memory_space<vmem>>, %arg4: memref<128x256xbf16, #tpu.memory_space<vmem>>, %arg5: memref<1x256xf32, #tpu.memory_space<vmem>>, %arg6: memref<16x128xbf16, #tpu.memory_space<vmem>>, %arg7: memref<1x128xf32, #tpu.memory_space<vmem>>, %arg8: memref<128x64xbf16, #tpu.memory_space<vmem>>, %arg9: memref<1x64xf32, #tpu.memory_space<vmem>>, %arg10: memref<32x16xf32, #tpu.memory_space<vmem>>, %arg11: memref<32x64xbf16, #tpu.memory_space<vmem>>, %arg12: memref<32x16xf32, #tpu.memory_space<vmem>>, %arg13: memref<32x16xf32, #tpu.memory_space<vmem>>) attributes {dimension_semantics = [#tpu.dimension_semantics<parallel>], iteration_bounds = array<i64: 2>, scalar_prefetch = 0 : i64, scratch_operands = 0 : i64, tpu.core_type = #tpu.core_type<tc>, window_params = [{transform_indices = @transform_0, window_bounds = array<i64: 32, 64>}, {pipeline_mode = #tpu.pipeline_mode<synchronous>, transform_indices = @transform_1, window_bounds = array<i64: 64, 128>}, {pipeline_mode = #tpu.pipeline_mode<synchronous>, transform_indices = @transform_2, window_bounds = array<i64: 1, 128>}, {pipeline_mode = #tpu.pipeline_mode<synchronous>, transform_indices = @transform_3, window_bounds = array<i64: 128, 256>}, {pipeline_mode = #tpu.pipeline_mode<synchronous>, transform_indices = @transform_4, window_bounds = array<i64: 1, 256>}, {pipeline_mode = #tpu.pipeline_mode<synchronous>, transform_indices = @transform_5, window_bounds = array<i64: 16, 128>}, {pipeline_mode = #tpu.pipeline_mode<synchronous>, transform_indices = @transform_6, window_bounds = array<i64: 1, 128>}, {pipeline_mode = #tpu.pipeline_mode<synchronous>, transform_indices = @transform_7, window_bounds = array<i64: 128, 64>}, {pipeline_mode = #tpu.pipeline_mode<synchronous>, transform_indices = @transform_8, window_bounds = array<i64: 1, 64>}, {transform_indices = @transform_9, window_bounds = array<i64: 32, 16>}, {transform_indices = @transform_10, window_bounds = array<i64: 32, 64>}, {transform_indices = @transform_11, window_bounds = array<i64: 32, 16>}, {transform_indices = @transform_12, window_bounds = array<i64: 32, 16>}]} {
    %c0 = arith.constant 0 : index
    %c0_0 = arith.constant 0 : index
    %0 = vector.load %arg1[%c0, %c0_0] : memref<32x64xf32, #tpu.memory_space<vmem>>, vector<32x64xf32>
    %1 = arith.truncf %0 : vector<32x64xf32> to vector<32x64xbf16>
    %c0_1 = arith.constant 0 : index
    %c0_2 = arith.constant 0 : index
    %2 = vector.load %arg2[%c0_1, %c0_2] : memref<64x128xbf16, #tpu.memory_space<vmem>>, vector<64x128xbf16>
    %cst = arith.constant dense<0.000000e+00> : vector<32x128xf32>
    %3 = tpu.matmul %1, %2, %cst {dimension_numbers = #tpu.dot_dimension_numbers<[1], [0], [0], [1], [0, 0, 1, 1], [], []>} : vector<32x64xbf16>, vector<64x128xbf16>, vector<32x128xf32> -> vector<32x128xf32>
    %c0_3 = arith.constant 0 : index
    %c0_4 = arith.constant 0 : index
    %4 = vector.load %arg3[%c0_3, %c0_4] : memref<1x128xf32, #tpu.memory_space<vmem>>, vector<1x128xf32>
    %5 = vector.broadcast %4 : vector<1x128xf32> to vector<32x128xf32>
    %6 = arith.addf %3, %5 : vector<32x128xf32>
    %cst_5 = arith.constant 0.000000e+00 : f32
    %7 = vector.broadcast %cst_5 : f32 to vector<32x128xf32>
    %8 = arith.maximumf %6, %7 : vector<32x128xf32>
    %9 = arith.truncf %8 : vector<32x128xf32> to vector<32x128xbf16>
    %c0_6 = arith.constant 0 : index
    %c0_7 = arith.constant 0 : index
    %10 = vector.load %arg4[%c0_6, %c0_7] : memref<128x256xbf16, #tpu.memory_space<vmem>>, vector<128x256xbf16>
    %cst_8 = arith.constant dense<0.000000e+00> : vector<32x256xf32>
    %11 = tpu.matmul %9, %10, %cst_8 {dimension_numbers = #tpu.dot_dimension_numbers<[1], [0], [0], [1], [0, 0, 1, 1], [], []>} : vector<32x128xbf16>, vector<128x256xbf16>, vector<32x256xf32> -> vector<32x256xf32>
    %c0_9 = arith.constant 0 : index
    %c0_10 = arith.constant 0 : index
    %12 = vector.load %arg5[%c0_9, %c0_10] : memref<1x256xf32, #tpu.memory_space<vmem>>, vector<1x256xf32>
    %13 = vector.broadcast %12 : vector<1x256xf32> to vector<32x256xf32>
    %14 = arith.addf %11, %13 : vector<32x256xf32>
    %15 = vector.extract_strided_slice %14 {offsets = [0, 0], sizes = [32, 16], strides = [1, 1]} : vector<32x256xf32> to vector<32x16xf32>
    %16 = vector.extract_strided_slice %14 {offsets = [0, 128], sizes = [32, 16], strides = [1, 1]} : vector<32x256xf32> to vector<32x16xf32>
    %cst_11 = arith.constant 5.000000e-01 : f32
    %17 = vector.broadcast %cst_11 : f32 to vector<32x16xf32>
    %18 = arith.mulf %17, %16 : vector<32x16xf32>
    %19 = math.exp %18 : vector<32x16xf32>
    %c0_12 = arith.constant 0 : index
    %c0_13 = arith.constant 0 : index
    %20 = vector.load %arg10[%c0_12, %c0_13] : memref<32x16xf32, #tpu.memory_space<vmem>>, vector<32x16xf32>
    %21 = arith.mulf %20, %19 : vector<32x16xf32>
    %22 = arith.addf %15, %21 : vector<32x16xf32>
    %23 = arith.truncf %22 : vector<32x16xf32> to vector<32x16xbf16>
    %c0_14 = arith.constant 0 : index
    %c0_15 = arith.constant 0 : index
    %24 = vector.load %arg6[%c0_14, %c0_15] : memref<16x128xbf16, #tpu.memory_space<vmem>>, vector<16x128xbf16>
    %cst_16 = arith.constant dense<0.000000e+00> : vector<32x128xf32>
    %25 = tpu.matmul %23, %24, %cst_16 {dimension_numbers = #tpu.dot_dimension_numbers<[1], [0], [0], [1], [0, 0, 1, 1], [], []>} : vector<32x16xbf16>, vector<16x128xbf16>, vector<32x128xf32> -> vector<32x128xf32>
    %c0_17 = arith.constant 0 : index
    %c0_18 = arith.constant 0 : index
    %26 = vector.load %arg7[%c0_17, %c0_18] : memref<1x128xf32, #tpu.memory_space<vmem>>, vector<1x128xf32>
    %27 = vector.broadcast %26 : vector<1x128xf32> to vector<32x128xf32>
    %28 = arith.addf %25, %27 : vector<32x128xf32>
    %cst_19 = arith.constant 0.000000e+00 : f32
    %29 = vector.broadcast %cst_19 : f32 to vector<32x128xf32>
    %30 = arith.maximumf %28, %29 : vector<32x128xf32>
    %31 = arith.truncf %30 : vector<32x128xf32> to vector<32x128xbf16>
    %c0_20 = arith.constant 0 : index
    %c0_21 = arith.constant 0 : index
    %32 = vector.load %arg8[%c0_20, %c0_21] : memref<128x64xbf16, #tpu.memory_space<vmem>>, vector<128x64xbf16>
    %cst_22 = arith.constant dense<0.000000e+00> : vector<32x64xf32>
    %33 = tpu.matmul %31, %32, %cst_22 {dimension_numbers = #tpu.dot_dimension_numbers<[1], [0], [0], [1], [0, 0, 1, 1], [], []>} : vector<32x128xbf16>, vector<128x64xbf16>, vector<32x64xf32> -> vector<32x64xf32>
    %c0_23 = arith.constant 0 : index
    %c0_24 = arith.constant 0 : index
    %34 = vector.load %arg9[%c0_23, %c0_24] : memref<1x64xf32, #tpu.memory_space<vmem>>, vector<1x64xf32>
    %35 = vector.broadcast %34 : vector<1x64xf32> to vector<32x64xf32>
    %36 = arith.addf %33, %35 : vector<32x64xf32>
    %37 = arith.truncf %36 : vector<32x64xf32> to vector<32x64xbf16>
    %c0_25 = arith.constant 0 : index
    %c0_26 = arith.constant 0 : index
    %38 = vector.load %arg11[%c0_25, %c0_26] : memref<32x64xbf16, #tpu.memory_space<vmem>>, vector<32x64xbf16>
    tpu.vector_store %arg11[%c0_25, %c0_26], %37 {strides = array<i32>} : memref<32x64xbf16, #tpu.memory_space<vmem>>, vector<32x64xbf16>,
    %c0_27 = arith.constant 0 : index
    %c0_28 = arith.constant 0 : index
    %39 = vector.load %arg12[%c0_27, %c0_28] : memref<32x16xf32, #tpu.memory_space<vmem>>, vector<32x16xf32>
    tpu.vector_store %arg12[%c0_27, %c0_28], %15 {strides = array<i32>} : memref<32x16xf32, #tpu.memory_space<vmem>>, vector<32x16xf32>,
    %c0_29 = arith.constant 0 : index
    %c0_30 = arith.constant 0 : index
    %40 = vector.load %arg13[%c0_29, %c0_30] : memref<32x16xf32, #tpu.memory_space<vmem>>, vector<32x16xf32>
    tpu.vector_store %arg13[%c0_29, %c0_30], %16 {strides = array<i32>} : memref<32x16xf32, #tpu.memory_space<vmem>>, vector<32x16xf32>,
    return
  }
  func.func @transform_0(%arg0: i32) -> (i32, i32) {
    %c0_i32 = arith.constant 0 : i32
    %c0_i32_0 = arith.constant 0 : i32
    return %arg0, %c0_i32 : i32, i32
  }
  func.func @transform_1(%arg0: i32) -> (i32, i32) {
    %c0_i32 = arith.constant 0 : i32
    %c0_i32_0 = arith.constant 0 : i32
    %c0_i32_1 = arith.constant 0 : i32
    return %c0_i32, %c0_i32_0 : i32, i32
  }
  func.func @transform_2(%arg0: i32) -> (i32, i32) {
    %c0_i32 = arith.constant 0 : i32
    %c0_i32_0 = arith.constant 0 : i32
    %c0_i32_1 = arith.constant 0 : i32
    return %c0_i32, %c0_i32_0 : i32, i32
  }
  func.func @transform_3(%arg0: i32) -> (i32, i32) {
    %c0_i32 = arith.constant 0 : i32
    %c0_i32_0 = arith.constant 0 : i32
    %c0_i32_1 = arith.constant 0 : i32
    return %c0_i32, %c0_i32_0 : i32, i32
  }
  func.func @transform_4(%arg0: i32) -> (i32, i32) {
    %c0_i32 = arith.constant 0 : i32
    %c0_i32_0 = arith.constant 0 : i32
    %c0_i32_1 = arith.constant 0 : i32
    return %c0_i32, %c0_i32_0 : i32, i32
  }
  func.func @transform_5(%arg0: i32) -> (i32, i32) {
    %c0_i32 = arith.constant 0 : i32
    %c0_i32_0 = arith.constant 0 : i32
    %c0_i32_1 = arith.constant 0 : i32
    return %c0_i32, %c0_i32_0 : i32, i32
  }
  func.func @transform_6(%arg0: i32) -> (i32, i32) {
    %c0_i32 = arith.constant 0 : i32
    %c0_i32_0 = arith.constant 0 : i32
    %c0_i32_1 = arith.constant 0 : i32
    return %c0_i32, %c0_i32_0 : i32, i32
  }
  func.func @transform_7(%arg0: i32) -> (i32, i32) {
    %c0_i32 = arith.constant 0 : i32
    %c0_i32_0 = arith.constant 0 : i32
    %c0_i32_1 = arith.constant 0 : i32
    return %c0_i32, %c0_i32_0 : i32, i32
  }
  func.func @transform_8(%arg0: i32) -> (i32, i32) {
    %c0_i32 = arith.constant 0 : i32
    %c0_i32_0 = arith.constant 0 : i32
    %c0_i32_1 = arith.constant 0 : i32
    return %c0_i32, %c0_i32_0 : i32, i32
  }
  func.func @transform_9(%arg0: i32) -> (i32, i32) {
    %c0_i32 = arith.constant 0 : i32
    %c0_i32_0 = arith.constant 0 : i32
    return %arg0, %c0_i32 : i32, i32
  }
  func.func @transform_10(%arg0: i32) -> (i32, i32) {
    %c0_i32 = arith.constant 0 : i32
    %c0_i32_0 = arith.constant 0 : i32
    return %arg0, %c0_i32 : i32, i32
  }
  func.func @transform_11(%arg0: i32) -> (i32, i32) {
    %c0_i32 = arith.constant 0 : i32
    %c0_i32_0 = arith.constant 0 : i32
    return %arg0, %c0_i32 : i32, i32
  }
  func.func @transform_12(%arg0: i32) -> (i32, i32) {
    %c0_i32 = arith.constant 0 : i32
    %c0_i32_0 = arith.constant 0 : i32
    return %arg0, %c0_i32 : i32, i32
  }
}

</mosaic_0001>

<bundles_post_ra>
// kernel: _vae_forward_impl.1
= control target key start
LH: loop header
LB: loop body
LE: loop exit
PB: predicated region body
PF: predicated region fallthrough
CT: control target
= control target key end

     0   :  { %s2065_s0 = inlined_call_operand.hbm [shape: f32[64,64], index: 0, kind: input, shape index: {}]   ;;  %s2066_s1 = inlined_call_operand.vmem [shape: bf16[64,128], index: 1, kind: input, shape index: {}]   ;;  %s2067_s2 = inlined_call_operand.hbm [shape: f32[1,128], index: 2, kind: input, shape index: {}]   ;;  %s2068_s3 = inlined_call_operand.vmem [shape: bf16[128,256], index: 3, kind: input, shape index: {}]   ;;  %s2069_s4 = inlined_call_operand.vmem [shape: f32[1,256], index: 4, kind: input, shape index: {}]   ;;  %s2070_s5 = inlined_call_operand.hbm [shape: bf16[16,128], index: 5, kind: input, shape index: {}]   ;;  %s2071_s6 = inlined_call_operand.vmem [shape: f32[1,128], index: 6, kind: input, shape index: {}]   ;;  %s2072_s7 = inlined_call_operand.vmem [shape: bf16[128,64], index: 7, kind: input, shape index: {}]   ;;  %s2073_s8 = inlined_call_operand.vmem [shape: f32[1,64], index: 8, kind: input, shape index: {}]   ;;  %s2074_s9 = inlined_call_operand.vmem [shape: f32[64,16], index: 9, kind: input, shape index: {}]   ;;  %s2075_s10 = inlined_call_operand.hbm [shape: bf16[64,64], index: 10, kind: output, shape index: {0}]   ;;  %s2076_s11 = inlined_call_operand.vmem [shape: f32[64,16], index: 11, kind: output, shape index: {1}]   ;;  %s2077_s12 = inlined_call_operand.vmem [shape: f32[64,16], index: 12, kind: output, shape index: {2}]  }
   0x1   :  { %2091 = sst [smem:[#allocation18_spill]] %s2067_s2 }
   0x2   :  { %2092 = sst [smem:[#allocation19_spill]] %s2073_s8 }
   0x3   :  { %2093 = sst [smem:[#allocation20_spill]] %s2075_s10 }
   0x4   :  { %18 = vsyncpa [#allocation3], 0 }
   0x5   :  { %20 = vsyncpa [#allocation3 + $0x1], 0 }
   0x6   :  { %21 = vsyncpa [#allocation6], 0 }
   0x7   :  { %22 = vsyncpa [#allocation4], 0 }
   0x8   :  { %24 = vsyncpa [#allocation4 + $0x1], 0  ;;  %s1697_s21 = smov 0   ;;  %s1699_s22 = smov 0  }
   0x9   :  { %s1701_s23 = smov 0   ;;  %s1703_s24 = smov 0  }
   0xa LB: > { %2094 = sst [smem:[#allocation12_spill]] %s1607_s21  ;;  %s1718_s25 = sadd.s32 4294967295, %s1619_s24   ;;  %s1619_s24 = sphi %s1703_s24, %s2122_s24   ;;  %s1615_s23 = sphi %s1701_s23, %s2124_s23   ;;  %s1611_s22 = sphi %s1699_s22, %s2126_s22   ;;  %s1607_s21 = sphi %s1697_s21, %s2125_s21  }
   0xb   : > { %2095 = sst [smem:[#allocation13_spill]] %s1615_s23  ;;  %s1217_s26 = sadd.s32 4294967294, %s1619_s24  }
   0xc   : > { %s1722_s27 = sadd.s32 1, %s1619_s24   ;;  %s37_s28 = sadd.s32 1, %s1615_s23 }
   0xd   : > { %2096 = sst [smem:[#allocation14_spill]] %s1722_s27  ;;  %s34_s29 = ssub.s32 %s1619_s24, %s1722_s27 }
   0xe   : > { %p44_p0 = scmp.ne.s32.totalorder %s1615_s23, %s1611_s22  ;;  %p35_p1 = scmp.eq.s32.totalorder %s34_s29, 0 }
   0xf   : > { %p45_p2 = scmp.eq.s32.totalorder %s1619_s24, 0  ;;  %p50_p3 = scmp.ne.s32.totalorder %s1611_s22, %s1607_s21 }
  0x10   : > { %p2078_p4 = scmp.eq.s32.totalorder %s1718_s25, 0  ;;  %p268_p7 = scmp.eq.s32.totalorder %s1718_s25, 1 }
  0x11   : > { %s1734_s30 = scalar_select %p35_p1, %s1615_s23, %s37_s28  }
  0x12   : > { %p1736_p5 = por %p45_p2, %p44_p0  ;;  %p1742_p6 = por %p2078_p4, %p50_p3 }
  0x13   : > { %2097 = sst [smem:[#allocation15_spill]] %s1734_s30  ;;  %p274_p8 = scmp.eq.s32.totalorder %s1217_s26, 1 }
  0x14   : > { %s2099_s14 = scalar_select %p1742_p6, 1, 0 }
  0x15   : > { %p1218_p9 = scmp.ge.s32.totalorder %s1619_s24, 1  ;;  %p333_p10 = scmp.lt.s32.totalorder %s1619_s24, 3 }
  0x16   : > { %p1749_p11 = por %p268_p7, %p44_p0  ;;  %p1753_p12 = por %p274_p8, %p50_p3 }
  0x17   : > { %p1757_p13 = pnand %p1218_p9, %p333_p10  ;;  %s1621_s18 = smov [#allocation5]  }
  0x18   : > { %s2100_s15 = scalar_select %p1749_p11, 1, 0 }
  0x19   : > { %s2102_s16 = scalar_select %p1753_p12, 1, 0 }
  0x1a   : > { %2101 = sst [smem:[#allocation16_spill]] %s2100_s15  ;;  %p1356_p2 = pneg %p1757_p13 }
  0x1b   : > { %2103 = sst [smem:[#allocation17_spill]] %s2102_s16  ;;  %s349_s19 = sshll.u32 %s1621_s18, 4  ;;  %s350_s19 = int_to_ptr.vmem [resolvable:$true] %s349_s19 }
  0x1c   : > { %s2104_s17 = scalar_select %p1757_p13, 1, 0 }
  0x1d   : > { %p1373_p4 = scmp.lt.s32.totalorder %s1619_s24, 2  ;;  %p2105_p0 = scmp.eq.s32.totalorder %s1718_s25, 0 }
  0x1e   : > { %s1622_s28 = smov [#allocation7]   ;;  %s2108_s2 = sld [smem:[#allocation18_spill]] }
  0x1f   : > { %p1767_p7 = pnand %p1356_p2, %p2105_p0  ;;  %p1773_p3 = pnand %p1373_p4, %p1736_p5 }
  0x20   : > { %s365_s29 = sshll.u32 %s1622_s28, 4  ;;  %s1777_s29 = int_to_ptr.vmem [resolvable:$true] %s365_s29 }
  0x21   : > { %s2107_s26 = scalar_select %p1773_p3, 1, 0 }
  0x22   : > { %p1465_p9 = pneg %p1767_p7 }
  0x24   : > { %s1463_s27 = scalar_lea.hbm %s2108_s2, 16 }
  0x25   : > { %p1464_p8 = scmp.ne.s32.totalorder %s2108_s2, %s1463_s27  ;;  %p1470_p10 = scmp.lt.u32.totalorder %s1463_s27, %s2108_s2 }
  0x27   : > { %p1466_p4 = pnand %p1465_p9, %p1464_p8 }
  0x29   : > { %p1467_p5 = pneg %p1466_p4 }
  0x2b   : > { %p1472_p2 = pnand %p1470_p10, %p1467_p5 }
  0x2d   : > { %1475 = shalt.err (!%p1472_p2)
}
  0x2e   : > { %s1476_s28 = scalar_lea.vmem %s350_s19, 16  ;;  %s1483_s21 = scalar_lea.vmem %s350_s19, 32 }
  0x2f   : > { %p1477_p0 = scmp.ne.s32.totalorder %s350_s19, %s1476_s28  ;;  %p1484_p11 = scmp.lt.s32.totalorder %s350_s19, %s350_s19 }
  0x30   : > { %p1485_p6 = scmp.lt.s32.totalorder %s1483_s21, %s1476_s28 }
  0x31   : > { %p1479_p1 = pnand %p1477_p0, %p1465_p9 }
  0x32   : > { %p1486_p13 = por %p1485_p6, %p1484_p11 }
  0x33   : > { %p1480_p12 = pneg %p1479_p1 }
  0x35   : > { %p1487_p3 = pnand %p1486_p13, %p1480_p12 }
  0x37   : > { %1490 = shalt.err (!%p1487_p3)
}
  0x38   : > { %1359 = dma.hbm_to_vmem [thread:$0]  (!%p1767_p7), %s2108_s2, 16, %s350_s19, [#allocation6]  }
  0x39   : > { %s388_s27 = sand.u32 1, %s1615_s23   ;;  %s1491_s13 = scalar_lea.hbm %s2070_s5, 128 }
  0x3a   : > { %p1492_p1 = scmp.ne.s32.totalorder %s2070_s5, %s1491_s13  ;;  %p1498_p12 = scmp.lt.u32.totalorder %s1491_s13, %s2070_s5 }
  0x3c   : > { %p1494_p6 = pnand %p1492_p1, %p1465_p9 }
  0x3e   : > { %p1495_p11 = pneg %p1494_p6 }
  0x40   : > { %p1500_p13 = pnand %p1498_p12, %p1495_p11 }
  0x42   : > { %1503 = shalt.err (!%p1500_p13)
}
  0x43   : > { %s1504_s19 = scalar_lea.vmem %s1777_s29, 128  ;;  %p1512_p5 = scmp.lt.s32.totalorder %s1777_s29, %s1777_s29 }
  0x44   : > { %p1505_p3 = scmp.ne.s32.totalorder %s1777_s29, %s1504_s19  ;;  %p1513_p10 = scmp.lt.s32.totalorder %s1504_s19, %s1504_s19 }
  0x46   : > { %p1507_p8 = pnand %p1505_p3, %p1465_p9  ;;  %p1514_p2 = por %p1513_p10, %p1512_p5 }
  0x48   : > { %p1508_p4 = pneg %p1507_p8 }
  0x4a   : > { %p1515_p0 = pnand %p1514_p2, %p1508_p4 }
  0x4c   : > { %1518 = shalt.err (!%p1515_p0)
}
  0x4d   : > { %s1623_s8 = smov 64   ;;  %s1624_s15 = smov 4  }
  0x4e   : > { %1362 = dma.hbm_to_vmem [thread:$0]  (!%p1767_p7), %s2070_s5, 128, %s1777_s29, [#allocation6], %s1623_s8, %s1623_s8, %s1624_s15  }
  0x4f   : > { %s1222_s16 = sshll.u32 %s388_s27, 5  ;;  %s1281_s18 = sshll.u32 %s1619_s24, 9 }
  0x50   : > { %s1831_s21 = scalar_lea.hbm %s2065_s0, %s1281_s18  ;;  %s392_s19 = scalar_lea.vmem [#allocation2], %s1222_s16 }
  0x51   : > { %s399_s2 = sshll.u32 %s392_s19, 4  ;;  %s1835_s20 = scalar_lea.sflag [#allocation3], %s388_s27  ;;  %s1833_s2 = int_to_ptr.vmem [resolvable:$true] %s399_s2 }
  0x52   : > { %s1519_s23 = scalar_lea.hbm %s1831_s21, 512  ;;  %p2109_p7 = scmp.ne.s32.totalorder %s2107_s26, 0 }
  0x53   : > { %p1520_p9 = scmp.ne.s32.totalorder %s1831_s21, %s1519_s23  ;;  %s1524_s15 = scalar_lea.hbm %s2065_s0, 1024 }
  0x54   : > { %p1521_p1 = pneg %p2109_p7  ;;  %p1525_p12 = scmp.lt.u32.totalorder %s1831_s21, %s2065_s0 }
  0x55   : > { %p1526_p13 = scmp.lt.u32.totalorder %s1524_s15, %s1519_s23  ;;  %p1528_p8 = scmp.lt.u32.totalorder %s1519_s23, %s1831_s21 }
  0x56   : > { %p1522_p6 = pnand %p1521_p1, %p1520_p9 }
  0x57   : > { %p1527_p3 = por %p1526_p13, %p1525_p12 }
  0x58   : > { %p1523_p11 = pneg %p1522_p6 }
  0x59   : > { %p1529_p4 = por %p1528_p8, %p1527_p3 }
  0x5b   : > { %p1530_p5 = pnand %p1529_p4, %p1523_p11 }
  0x5d   : > { %1533 = shalt.err (!%p1530_p5)
}
  0x5e   : > { %s1534_s27 = scalar_lea.vmem %s1833_s2, 512  ;;  %s1625_s16 = smov [#allocation2]  }
  0x5f   : > { %p1535_p10 = scmp.ne.s32.totalorder %s1833_s2, %s1534_s27  ;;  %s1539_s18 = sshll.u32 %s1625_s16, 4  ;;  %s1540_s18 = int_to_ptr.vmem [resolvable:$false] %s1539_s18 }
  0x60   : > { %s1541_s13 = scalar_lea.vmem %s1540_s18, 1024  ;;  %p1542_p9 = scmp.lt.s32.totalorder %s1833_s2, %s1540_s18 }
  0x61   : > { %p1537_p2 = pnand %p1535_p10, %p1521_p1  ;;  %p1543_p6 = scmp.lt.s32.totalorder %s1541_s13, %s1534_s27 }
  0x63   : > { %p1538_p0 = pneg %p1537_p2  ;;  %p1544_p12 = por %p1543_p6, %p1542_p9 }
  0x65   : > { %p1545_p13 = pnand %p1544_p12, %p1538_p0 }
  0x67   : > { %1548 = shalt.err (!%p1545_p13)
}
  0x68   : > { %s1626_s23 = smov 128   ;;  %s1627_s28 = smov 8  }
  0x69   : > { %1366 = dma.hbm_to_vmem [thread:$0]  (!%p2109_p7), %s1831_s21, 512, %s1833_s2, %s1835_s20, %s1626_s23, %s1626_s23, %s1627_s28  }
  0x6a   : > { %p2110_p1 = scmp.ne.s32.totalorder %s2104_s17, 0 }
  0x6b   : > { %s1866_s19 = sand.u32 (!%p2110_p1), 1, %s1611_s22   ;;  %p2111_p11 = scmp.ne.s32.totalorder (!%p2110_p1), %s2099_s14, 0 }
  0x6c   : > { %420 = sbr.rel (%p2110_p1) target bundleno = 1059 (0x423), region = 60  ;;  %s1226_s29 = sshll.u32 (!%p2110_p1), %s1866_s19, 5 }
  0x6d   : > { %s423_s8 = scalar_lea.sflag (!%p2110_p1), [#allocation3], %s1866_s19  ;;  %s426_s15 = scalar_lea.vmem (!%p2110_p1), [#allocation2], %s1226_s29 }
  0x73   : > { %1594 = dma.done.wait (%p2111_p11), %s423_s8, 512  }
  0x74   : > { %1596 = vsyncadd (%p2111_p11), %s423_s8, 4294966784  ;;  %p2112_p3 = scmp.eq.s32.totalorder %s1718_s25, 0 }
  0x76   : > { %1598 = dma.done.wait (%p2112_p3), [#allocation6], 144   ;;  %p2113_p7 = pmov %p2112_p3 }
  0x77   : > { %v1418_v0 = vld [vmem:[%s2066_s1] sm:$0xff]   ;;  %v1419_v1 = vld [vmem:[%s2066_s1 + $0x8] sm:$0xff]   ;;  %v1420_v2 = vld [vmem:[%s2066_s1 + $0x10] sm:$0xff]   ;;  %vm556_vm0 = vcmask 523264   ;;  %v1628_v26 = vmov 0   ;;  %v636_v49 = vlaneseq  ;;  %s1230_s26 = sshll.u32 %s1718_s25, 2 }
  0x78   : > { %1600 = vsyncadd (%p2113_p7), [#allocation6], 4294967152  ;;  %1306 = vmatprep.subr.bf16.mxu0 %v1418_v0  ;;  %v511_v3 = vld [vmem:[%s426_s15] sm:$0xff]  ;;  %v512_v4 = vld [vmem:[%s426_s15 + $0x8] sm:$0xff]  ;;  %758 = vmatprep.mubr.bf16.mxu1 %v1628_v26  ;;  %p492_p8 = scmp.lt.s32.totalorder %s1230_s26, 7  ;;  %vm820_vm1 = vcmask 130048  }
  0x79   : > { %1307 = vmatpush3.bf16.msra.mxu0 %v1418_v0  ;;  %v515_v5 = vpack.c.bf16 %v512_v4, %v511_v3  ;;  %v1422_v6 = vld [vmem:[%s2068_s3 + $0x4] ss:$8 sps:$4 sm:$0xff]   ;;  %v1424_v7 = vld [vmem:[%s2068_s3] ss:$8 sps:$4 sm:$0xff]   ;;  %v1425_v8 = vld [vmem:[%s2068_s3 + $0x14] ss:$8 sps:$4 sm:$0xff]  }
  0x7a   : > { %1308 = vmatprep.subr.bf16.mxu0 %v1419_v1  ;;  %v1421_v9 = vld [vmem:[%s2066_s1 + $0x18] sm:$0xff]   ;;  %726 = vmatprep.subr.bf16.mxu1 %v1422_v6  ;;  %v1428_v11 = vld [vmem:[%s2068_s3 + $0x24] ss:$8 sps:$4 sm:$0xff]   ;;  %v513_v12 = vld [vmem:[%s426_s15 + $0x10] sm:$0xff]  ;;  %v637_v50 = vshrl.u32 %v636_v49, 7  ;;  %s2128_s26 = smov (!%p492_p8, %s1230_s26), 7 }
  0x7b   : > { %1314 = vmatprep.mubr.msk.bf16.mxu0 %vm556_vm0, %v515_v5  ;;  %727 = vmatpush1.bf16.msra.mxu1 %v1424_v7  ;;  %v1427_v10 = vld [vmem:[%s2068_s3 + $0x10] ss:$8 sps:$4 sm:$0xff]   ;;  %v1430_v14 = vld [vmem:[%s2068_s3 + $0x20] ss:$8 sps:$4 sm:$0xff]   ;;  %v1431_v15 = vld [vmem:[%s2068_s3 + $0x34] ss:$8 sps:$4 sm:$0xff]  }
  0x7c   : > { %728 = vmatprep.subr.bf16.mxu1 %v1425_v8  ;;  %v514_v13 = vld [vmem:[%s426_s15 + $0x18] sm:$0xff]  ;;  %v1434_v18 = vld [vmem:[%s2068_s3 + $0x44] ss:$8 sps:$4 sm:$0xff]   ;;  %v1436_v19 = vld [vmem:[%s2068_s3 + $0x40] ss:$8 sps:$4 sm:$0xff]   ;;  %v638_v51 = vsub.s32 0, %v637_v50 }
  0x7d   : > { %1309 = vmatpush3.bf16.msra.mxu0 %v1419_v1  ;;  %v516_v16 = vpack.c.bf16 %v514_v13, %v513_v12  ;;  %v1433_v17 = vld [vmem:[%s2068_s3 + $0x30] ss:$8 sps:$4 sm:$0xff]   ;;  %v1437_v20 = vld [vmem:[%s2068_s3 + $0x54] ss:$8 sps:$4 sm:$0xff]   ;;  %v1440_v22 = vld [vmem:[%s2068_s3 + $0x64] ss:$8 sps:$4 sm:$0xff]  }
  0x7e   : > { %1310 = vmatprep.subr.bf16.mxu0 %v1420_v2  ;;  %v1439_v21 = vld [vmem:[%s2068_s3 + $0x50] ss:$8 sps:$4 sm:$0xff]   ;;  %v1442_v23 = vld [vmem:[%s2068_s3 + $0x60] ss:$8 sps:$4 sm:$0xff]   ;;  %v1443_v24 = vld [vmem:[%s2068_s3 + $0x74] ss:$8 sps:$4 sm:$0xff]  }
  0x7f   : > { %729 = vmatpush1.bf16.msra.mxu1 %v1427_v10  ;;  %v1445_v25 = vld [vmem:[%s2068_s3 + $0x70] ss:$8 sps:$4 sm:$0xff]   ;;  %v1236_v27 = vld [vmem:[#allocation5] ss:$0 sm:$0xff]  ;;  %v1446_v42 = vld [vmem:[#allocation7] sm:$0xff]   ;;  %v642_v53 = vsub.s32 1, %v637_v50 }
  0x80   : > { %730 = vmatprep.subr.bf16.mxu1 %v1428_v11  ;;  %v1447_v43 = vld [vmem:[%s2072_s7] sm:$0xff]   ;;  %v1448_v44 = vld [vmem:[%s2072_s7 + $0x8] sm:$0xff]   ;;  %v1449_v45 = vld [vmem:[%s2072_s7 + $0x10] sm:$0xff]   ;;  %s1962_s14 = sshll.u32 %s2128_s26, 3  ;;  %s1229_s20 = sshll.u32 %s1866_s19, 4  ;;  %vm1018_vm2 = vcmask 519168  }
  0x81   : > { %1311 = vmatpush3.bf16.msra.mxu0 %v1420_v2  ;;  %v1450_v46 = vld [vmem:[%s2072_s7 + $0x18] sm:$0xff]   ;;  %v1451_v47 = vld [vmem:[%s2072_s7 + $0x20] sm:$0xff]   ;;  %v1452_v48 = vld [vmem:[%s2072_s7 + $0x28] sm:$0xff]   ;;  %s1968_s27 = scalar_lea.vmem %s2076_s11, %s1962_s14  ;;  %s1974_s18 = scalar_lea.vmem %s2077_s12, %s1962_s14 }
  0x82   : > { %1312 = vmatprep.subr.bf16.mxu0 %v1421_v9  ;;  %v634_v52 = vld [vmem:[%s2069_s4] sm:$0x3]  ;;  %s495_s28 = scalar_lea.vmem %s2074_s9, %s1962_s14  ;;  %s2114_s10 = sld [smem:[#allocation19_spill]] }
  0x83   : > { %731 = vmatpush1.bf16.msra.mxu1 %v1430_v14  ;;  %v639_v54 = vrot.slane %v634_v52, %v638_v51  ;;  %v643_v55 = vrot.slane %v634_v52, %v642_v53  ;;  %s1286_s15 = sshll.u32 %s1718_s25, 8  ;;  %s1032_s25 = scalar_lea.sflag [#allocation4], %s1866_s19 }
  0x84   : > { %732 = vmatprep.subr.bf16.mxu1 %v1431_v15  ;;  %s1629_s2 = smov [#allocation8]  }
  0x85   : > { %1313 = vmatpush3.bf16.msra.mxu0 %v1421_v9  ;;  %s1553_s17 = sshll.u32 %s1629_s2, 4  ;;  %s1554_s17 = int_to_ptr.vmem [resolvable:$false] %s1553_s17 }
  0x86   : > { %1324 = vmatprep.subr.bf16.mxu0 %v1447_v43  ;;  %s1555_s26 = scalar_lea.vmem %s1554_s17, 512 }
  0x87   : > { %733 = vmatpush1.bf16.msra.mxu1 %v1433_v17 }
  0x88   : > { %1315 = vmatmul.mubr.msk.bf16.vlgmr.msra.gmra.mrb[0].mxu0 %vm556_vm0, %v516_v16  ;;  %734 = vmatprep.subr.bf16.mxu1 %v1434_v18  ;;  %v791_v16 = vld [vmem:[%s495_s28] sm:$0xff]  ;;  %v792_v18 = vld [vmem:[%s495_s28 + $0x8] sm:$0xff] }
  0x89   : > { %1325 = vmatpush3.bf16.msra.mxu0 %v1447_v43  ;;  %v1263_v51 = vld [vmem:[%s2114_s10] ss:$0 sm:$0xff] }
  0x8a   : > { %1326 = vmatprep.subr.bf16.mxu0 %v1448_v44 }
  0x8b   : > { %735 = vmatpush1.bf16.msra.mxu1 %v1436_v19 }
  0x8c   : > { %736 = vmatprep.subr.bf16.mxu1 %v1437_v20 }
  0x8d   : > { %1327 = vmatpush3.bf16.msra.mxu0 %v1448_v44 }
  0x8e   : > { %1328 = vmatprep.subr.bf16.mxu0 %v1449_v45 }
  0x8f   : > { %737 = vmatpush1.bf16.msra.mxu1 %v1439_v21 }
  0x90   : > { %738 = vmatprep.subr.bf16.mxu1 %v1440_v22 }
  0x91   : > { %1329 = vmatpush3.bf16.msra.mxu0 %v1449_v45 }
  0x92   : > { %1330 = vmatprep.subr.bf16.mxu0 %v1450_v46 }
  0x93   : > { %739 = vmatpush1.bf16.msra.mxu1 %v1442_v23 }
  0x94   : > { %740 = vmatprep.subr.bf16.mxu1 %v1443_v24  ;;  %v793_v24 = vld [vmem:[%s495_s28 + $0x10] sm:$0xff] }
  0x95   : > { %1331 = vmatpush3.bf16.msra.mxu0 %v1450_v46 }
  0x96   : > { %1332 = vmatprep.subr.bf16.mxu0 %v1451_v47 }
  0x97   : > { %741 = vmatpush1.bf16.msra.mxu1 %v1445_v25 }
  0x98   : > { %1318 = vmatprep.subr.bf16.mxu1 %v1446_v42 }
  0x99   : > { %1333 = vmatpush3.bf16.msra.mxu0 %v1451_v47 }
  0x9a   : > { %1334 = vmatprep.subr.bf16.mxu0 %v1452_v48 }
  0x9d   : > { %1335 = vmatpush3.bf16.msra.mxu0 %v1452_v48 }
 0x15b   : > { %v1316_v28 = vpop.f32.mrb[0].mxu0 }
 0x15c   : > { %v606_v29 = vadd.f32 %v1316_v28, %v1236_v27  ;;  %v597_v30 = vpop.f32.mrb[1].mxu0 }
 0x15d   : > { %v598_v31 = vadd.f32 %v1236_v27, %v597_v30  ;;  %v1317_v32 = vpop.f32.mrb[2].mxu0 }
 0x15e   : > { %v609_v33 = vadd.f32 %v1317_v32, %v1236_v27  ;;  %v600_v34 = vpop.f32.mrb[3].mxu0  ;;  %v614_v36 = vmax.f32 %v606_v29, 0.0 }
 0x15f   : > { %v601_v35 = vadd.f32 %v1236_v27, %v600_v34  ;;  %v612_v38 = vmax.f32 %v598_v31, 0.0  ;;  %v794_v27 = vld [vmem:[%s495_s28 + $0x18] sm:$0xff]  ;;  %v1453_v34 = vld [vmem:[%s2072_s7 + $0x30] sm:$0xff]   ;;  %s2116_s28 = sld [smem:[#allocation20_spill]] }
 0x160   : > { %v615_v37 = vmax.f32 %v609_v33, 0.0  ;;  %1336 = vmatprep.subr.bf16.mxu0 %v1453_v34 }
 0x161   : > { %v613_v39 = vmax.f32 %v601_v35, 0.0  ;;  %1337 = vmatpush3.bf16.msra.mxu0 %v1453_v34  ;;  %v1454_v35 = vld [vmem:[%s2072_s7 + $0x38] sm:$0xff]  }
 0x162   : > { %v617_v40 = vpack.c.bf16 %v615_v37, %v614_v36  ;;  %1338 = vmatprep.subr.bf16.mxu0 %v1454_v35  ;;  %v1259_v36 = vld [vmem:[%s2071_s6] ss:$0 sm:$0xff] }
 0x163   : > { %v616_v41 = vpack.c.bf16 %v613_v39, %v612_v38 }
 0x165   : > { %759 = vmatmul.mubr.bf16.vlgmr.msra.gmra.mrb[0].mxu1 %v616_v41  ;;  %1339 = vmatpush3.bf16.msra.mxu0 %v1454_v35  ;;  %s2018_s29 = scalar_lea.hbm %s2116_s28, %s1286_s15 }
 0x166   : > { %768 = vmatprep.mubr.bf16.mxu1 %v1628_v26  ;;  %1319 = vmatpush3.bf16.msra.mxu1 %v1446_v42 }
 0x16d   : > { %769 = vmatmul.mubr.bf16.gmra.mrb[4].mxu1 %v617_v40 }
 0x238   : > { %v760_v56 = vpop.f32.mrb[0].mxu1 }
 0x239   : > { %v761_v57 = vadd.f32 %v760_v56, %v639_v54  ;;  %v762_v58 = vpop.f32.mrb[1].mxu1 }
 0x23a   : > { %v763_v59 = vadd.f32 %v762_v58, %v643_v55  ;;  %v764_v60 = vpop.f32.mrb[2].mxu1 }
 0x23b   : > { %1023 = vst.msk [vmem:[%s1968_s27] sm:$0xff] %vm820_vm1, %v761_v57  ;;  %v765_v61 = vadd.f32 %v764_v60, %v639_v54  ;;  %v766_v62 = vpop.f32.mrb[3].mxu1 }
 0x23c   : > { %v779_v63 = vmul.f32 0.5, %v763_v59  ;;  %1027 = vst.msk [vmem:[%s1974_s18] sm:$0xff] %vm820_vm1, %v763_v59  ;;  %v767_v0 = vadd.f32 %v766_v62, %v643_v55 }
 0x23d   : > { %1024 = vst.msk [vmem:[%s1968_s27 + $0x8] sm:$0xff] %vm820_vm1, %v765_v61 }
 0x23e   : > { %v783_v1 = vmul.f32 1.442695, %v779_v63  ;;  %v780_v2 = vmul.f32 0.5, %v767_v0  ;;  %1028 = vst.msk [vmem:[%s1974_s18 + $0x8] sm:$0xff] %vm820_vm1, %v767_v0 }
 0x240   : > { %1455 = vpow2.f32 %v783_v1  ;;  %v785_v3 = vmul.f32 1.442695, %v780_v2  ;;  %v770_v4 = vpop.f32.mrb[4].mxu1 }
 0x241   : > { %v771_v5 = vadd.f32 %v770_v4, %v639_v54  ;;  %v772_v6 = vpop.f32.mrb[5].mxu1 }
 0x242   : > { %1457 = vpow2.f32 %v785_v3  ;;  %v773_v7 = vadd.f32 %v772_v6, %v643_v55  ;;  %v774_v8 = vpop.f32.mrb[6].mxu1 }
 0x243   : > { %1025 = vst.msk [vmem:[%s1968_s27 + $0x10] sm:$0xff] %vm820_vm1, %v771_v5  ;;  %v775_v9 = vadd.f32 %v774_v8, %v639_v54  ;;  %v776_v10 = vpop.f32.mrb[7].mxu1 }
 0x244   : > { %v781_v11 = vmul.f32 0.5, %v773_v7  ;;  %1029 = vst.msk [vmem:[%s1974_s18 + $0x10] sm:$0xff] %vm820_vm1, %v773_v7  ;;  %v777_v12 = vadd.f32 %v776_v10, %v643_v55 }
 0x245   : > { %1026 = vst.msk [vmem:[%s1968_s27 + $0x18] sm:$0xff] %vm820_vm1, %v775_v9  ;;  %s475_s27 = scalar_lea.vmem [#allocation8], %s1229_s20 }
 0x246   : > { %v787_v13 = vmul.f32 1.442695, %v781_v11  ;;  %v782_v14 = vmul.f32 0.5, %v777_v12  ;;  %1030 = vst.msk [vmem:[%s1974_s18 + $0x18] sm:$0xff] %vm820_vm1, %v777_v12  ;;  %s1055_s16 = sshll.u32 %s475_s27, 4  ;;  %s2115_s18 = sld [smem:[#allocation16_spill]]  ;;  %s2012_s16 = int_to_ptr.vmem [resolvable:$true] %s1055_s16 }
 0x247   : > { %s1549_s8 = scalar_lea.vmem %s2012_s16, 256  ;;  %p1556_p0 = scmp.lt.s32.totalorder %s2012_s16, %s1554_s17 }
 0x248   : > { %1459 = vpow2.f32 %v787_v13  ;;  %v789_v15 = vmul.f32 1.442695, %v782_v14  ;;  %p1550_p4 = scmp.ne.s32.totalorder %s2012_s16, %s1549_s8  ;;  %p1557_p9 = scmp.lt.s32.totalorder %s1555_s26, %s1549_s8 }
 0x24a   : > { %v1456_v17 = vpop.eup %1455  ;;  %1461 = vpow2.f32 %v789_v15  ;;  %p1558_p6 = por %p1557_p9, %p1556_p0 }
 0x24b   : > { %v795_v19 = vmul.f32 %v1456_v17, %v791_v16 }
 0x24c   : > { %v1458_v20 = vpop.eup %1457  ;;  %p2117_p5 = scmp.ne.s32.totalorder %s2115_s18, 0 }
 0x24d   : > { %v796_v21 = vmul.f32 %v1458_v20, %v792_v18  ;;  %v799_v22 = vadd.f32 %v795_v19, %v761_v57 }
 0x24e   : > { %p1551_p10 = pnand %p1550_p4, %p2117_p5 }
 0x24f   : > { %v800_v23 = vadd.f32 %v796_v21, %v765_v61 }
 0x250   : > { %p1552_p2 = pneg %p1551_p10 }
 0x251   : > { %v803_v25 = vpack.c.bf16 %v800_v23, %v799_v22 }
 0x252   : > { %v1460_v26 = vpop.eup %1459  ;;  %p1559_p12 = pnand %p1558_p6, %p1552_p2 }
 0x253   : > { %v797_v28 = vmul.f32 %v1460_v26, %v793_v24  ;;  %1320 = vmatprep.mubr.msk.bf16.mxu1 %vm820_vm1, %v803_v25 }
 0x254   : > { %v1462_v29 = vpop.eup %1461 }
 0x255   : > { %v801_v30 = vadd.f32 %v797_v28, %v771_v5  ;;  %v798_v31 = vmul.f32 %v1462_v29, %v794_v27 }
 0x257   : > { %v802_v32 = vadd.f32 %v798_v31, %v775_v9 }
 0x259   : > { %v804_v33 = vpack.c.bf16 %v802_v32, %v801_v30 }
 0x25b   : > { %1321 = vmatmul.mubr.msk.bf16.vlgmr.msra.gmra.mrb[8].mxu1 %vm820_vm1, %v804_v33 }
 0x32e   : > { %v1322_v37 = vpop.f32.mrb[8].mxu1 }
 0x32f   : > { %v870_v38 = vadd.f32 %v1322_v37, %v1259_v36  ;;  %v861_v39 = vpop.f32.mrb[9].mxu1 }
 0x330   : > { %v862_v40 = vadd.f32 %v1259_v36, %v861_v39  ;;  %v1323_v41 = vpop.f32.mrb[10].mxu1 }
 0x331   : > { %v873_v42 = vadd.f32 %v1323_v41, %v1259_v36  ;;  %v864_v43 = vpop.f32.mrb[11].mxu1  ;;  %v878_v45 = vmax.f32 %v870_v38, 0.0 }
 0x332   : > { %v865_v44 = vadd.f32 %v1259_v36, %v864_v43  ;;  %v876_v47 = vmax.f32 %v862_v40, 0.0 }
 0x333   : > { %v879_v46 = vmax.f32 %v873_v42, 0.0 }
 0x334   : > { %v877_v48 = vmax.f32 %v865_v44, 0.0 }
 0x335   : > { %v881_v49 = vpack.c.bf16 %v879_v46, %v878_v45 }
 0x336   : > { %v880_v50 = vpack.c.bf16 %v877_v48, %v876_v47 }
 0x338   : > { %1340 = vmatprep.mubr.bf16.mxu0 %v880_v50 }
 0x339   : > { %1341 = vmatmul.mubr.bf16.vlgmr.msra.gmra.mrb[4].mxu0 %v881_v49 }
 0x40c   : > { %v1342_v52 = vpop.f32.mrb[4].mxu0 }
 0x40d   : > { %v996_v53 = vadd.f32 %v1342_v52, %v1263_v51  ;;  %v987_v54 = vpop.f32.mrb[5].mxu0 }
 0x40e   : > { %v988_v55 = vadd.f32 %v1263_v51, %v987_v54  ;;  %v1343_v56 = vpop.f32.mrb[6].mxu0 }
 0x40f   : > { %v1284_v57 = vpack.c.bf16 %v996_v53, %v996_v53  ;;  %v999_v58 = vadd.f32 %v1343_v56, %v1263_v51  ;;  %v990_v59 = vpop.f32.mrb[7].mxu0 }
 0x410   : > { %v1282_v60 = vpack.c.bf16 %v988_v55, %v988_v55  ;;  %v991_v61 = vadd.f32 %v1263_v51, %v990_v59 }
 0x411   : > { %1021 = vst.msk [vmem:[%s475_s27 + $0x8] sm:$0xf] %vm1018_vm2, %v1284_v57  ;;  %v1285_v62 = vpack.c.bf16 %v999_v58, %v999_v58 }
 0x412   : > { %1019 = vst.msk [vmem:[%s475_s27] sm:$0xf] %vm1018_vm2, %v1282_v60  ;;  %v1283_v63 = vpack.c.bf16 %v991_v61, %v991_v61 }
 0x413   : > { %1022 = vst.msk [vmem:[%s475_s27 + $0xc] sm:$0xf] %vm1018_vm2, %v1285_v62 }
 0x414   : > { %1020 = vst.msk [vmem:[%s475_s27 + $0x4] sm:$0xf] %vm1018_vm2, %v1283_v63 }
 0x415   : > { %1562 = shalt.err (!%p1559_p12)
}
 0x416   : > { %s1563_s21 = scalar_lea.hbm %s2018_s29, 256  ;;  %s1567_s30 = scalar_lea.hbm %s2116_s28, 512 }
 0x417   : > { %p1564_p13 = scmp.ne.s32.totalorder %s2018_s29, %s1563_s21  ;;  %p1568_p3 = scmp.lt.u32.totalorder %s2018_s29, %s2116_s28 }
 0x418   : > { %p1569_p7 = scmp.lt.u32.totalorder %s1567_s30, %s1563_s21  ;;  %p1571_p4 = scmp.lt.u32.totalorder %s1563_s21, %s2018_s29 }
 0x419   : > { %p1565_p1 = pnand %p1564_p13, %p2117_p5 }
 0x41a   : > { %p1570_p8 = por %p1569_p7, %p1568_p3 }
 0x41b   : > { %p1566_p11 = pneg %p1565_p1 }
 0x41c   : > { %p1572_p10 = por %p1571_p4, %p1570_p8 }
 0x41e   : > { %p1573_p2 = pnand %p1572_p10, %p1566_p11 }
 0x420   : > { %1576 = shalt.err (!%p1573_p2)
}
 0x421   : > { %s1630_s15 = smov 64   ;;  %s1631_s13 = smov 4  }
 0x422   : > { %1354 = dma.vmem_to_hbm [thread:$0]  (%p2117_p5), %s2012_s16, 256, %s2018_s29, %s1032_s25, %s1630_s15, %s1630_s15, %s1631_s13  }
 0x423 PF: > { %s2118_s23 = sld [smem:[#allocation12_spill]]  ;;  %s2119_s8 = sld [smem:[#allocation17_spill]] }
 0x424   : > { %p2121_p9 = scmp.ge.s32.totalorder %s1619_s24, 2 }
 0x429   : > { %s1078_s2 = sand.u32 1, %s2118_s23   ;;  %p2120_p0 = scmp.ne.s32.totalorder %s2119_s8, 0 }
 0x42a   : > { %s1079_s17 = scalar_lea.sflag [#allocation4], %s1078_s2 }
 0x42b   : > { %p1368_p6 = pnand %p2121_p9, %p2120_p0 }
 0x42d   : > { %1602 = dma.done.wait (!%p1368_p6), %s1079_s17, 256  }
 0x42e   : > { %1604 = vsyncadd (!%p1368_p6), %s1079_s17, 4294967040  ;;  %s2122_s24 = sld [smem:[#allocation14_spill]]  ;;  %s2123_s26 = sld [smem:[#allocation13_spill]] }
 0x42f   : > { %s2124_s23 = sld [smem:[#allocation15_spill]]  ;;  %s2125_s21 = smov %s1611_s22 }
 0x434   : > { %p27_p12 = scmp.ge.s32.totalorder %s2122_s24, 4   ;;  %s2126_s22 = smov %s2123_s26 }
 0x436   :  { %29 = sbr.rel (!%p27_p12) target bundleno = 10 (0xa), region = 140 }
 0x43d   :  { %1100 = vsyncpa [#allocation3], 1 }
 0x43e   :  { %1102 = vsyncpa [#allocation3 + $0x1], 1 }
 0x43f   :  { %1103 = vsyncpa [#allocation6], 1 }
 0x440   :  { %1104 = vsyncpa [#allocation4], 1 }
 0x441   :  { %1106 = vsyncpa [#allocation4 + $0x1], 1 }

</bundles_post_ra>
